<compile_context>
chip_gen: v6e
topology: v6e:2x2x1
jax: 0.10.0
libtpu: 0.0.40
codegen_flags: <defaults>
</compile_context>

<pallas_src>
import math
from functools import partial

import jax
import jax.numpy as jnp
from jax import lax
from jax.experimental import pallas as pl
from jax.experimental.pallas import tpu as pltpu


def _round_up(x, m):
    return ((x + m - 1) // m) * m


def _dilated_residual_kernel(x_hbm_ref, w_dil_ref, b_dil_ref, w_1x1_ref,
                             b_1x1_ref, o_ref,
                             x_win, slab, copy_sem,
                             *, dilation, tile_t, c_pad, row_stride, row_align):
    d = dilation
    win = tile_t + 2 * d
    n = pl.program_id(0)
    ti = pl.program_id(1)
    n_t = pl.num_programs(1)
    slot = ti % 2

    def start_fetch(tile_idx, slot_idx):
        # Haloed window of the zero-padded input for this (batch, T-tile):
        # rows [n*row_stride + tile_idx*tile_t, +win) of the flattened
        # (N*(Tp+2d), Cp) array.
        row0 = n * row_stride + tile_idx * tile_t
        if row_align > 1:
            row0 = pl.multiple_of(row0, row_align)
        pltpu.make_async_copy(x_hbm_ref.at[pl.ds(row0, win), :],
                              x_win.at[slot_idx], copy_sem.at[slot_idx]).start()

    # First T-tile of this batch: its window was never prefetched -> fetch now.
    @pl.when(ti == 0)
    def _():
        start_fetch(0, 0)

    # Wait for the current tile's window (issued just above, or prefetched by the
    # previous grid step of this batch).
    row_cur = n * row_stride + ti * tile_t
    if row_align > 1:
        row_cur = pl.multiple_of(row_cur, row_align)
    pltpu.make_async_copy(x_hbm_ref.at[pl.ds(row_cur, win), :],
                          x_win.at[slot], copy_sem.at[slot]).wait()

    # Prefetch the next tile's window into the other slot; this DMA overlaps with
    # the compute below (T axis is "arbitrary": tiles of one batch run in order on
    # a single core, so the chain is always issued before it is waited on).
    @pl.when(ti + 1 < n_t)
    def _():
        start_fetch(ti + 1, 1 - slot)

    x_cur = x_win.at[slot]                              # (win, c_pad) f32 view
    x_c = x_cur[d:d + tile_t, :]                        # centre tap, reused for residual

    # Fused 3-tap dilated conv: pack the shifted views along the lane axis into a
    # (tile_t, 3*c_pad) bf16 slab -> single K = 3*c_pad MXU matmul.
    slab[:, 0 * c_pad:1 * c_pad] = x_cur[0:tile_t, :].astype(jnp.bfloat16)               # x[t-d]
    slab[:, 1 * c_pad:2 * c_pad] = x_c.astype(jnp.bfloat16)                              # x[t]
    slab[:, 2 * c_pad:3 * c_pad] = x_cur[2 * d:2 * d + tile_t, :].astype(jnp.bfloat16)   # x[t+d]

    h = jnp.dot(slab[...], w_dil_ref[...], preferred_element_type=jnp.float32)
    h = jnp.maximum(h + b_dil_ref[...], 0.0)            # bias + ReLU in f32

    out = jnp.dot(h.astype(jnp.bfloat16), w_1x1_ref[...],
                  preferred_element_type=jnp.float32) + b_1x1_ref[...]
    # TODO(synk): nn.Dropout is identity in eval mode; train mode would draw a
    # keep-mask with pltpu.prng_seed / pltpu.prng_random_bits per tile.

    o_ref[0] = (x_c + out).astype(o_ref.dtype)          # residual add in f32


def dilated_residual_layer_ntc(x_ntc, w_dil, b_dil, w_1x1, b_1x1, *,
                               dilation, tile_t=1024):
    """NTC-native entry point.  x_ntc: (N, T, C) f32; weights in torch Conv1d layout."""
    N, T, C = x_ntc.shape
    d = int(dilation)
    c_pad = _round_up(max(C, 128), 128)
    tile_t = _round_up(min(tile_t, _round_up(T, 8)), 8)
    t_pad = _round_up(T, tile_t)
    n_t = t_pad // tile_t
    row_stride = t_pad + 2 * d

    # Zero-pad once in HBM: `d` halo on both ends of T (+ tail up to t_pad),
    # channels padded up to a lane-dense multiple of 128.
    x_padded = jnp.pad(x_ntc.astype(jnp.float32),
                       ((0, 0), (d, d + t_pad - T), (0, c_pad - C)))
    x_flat = x_padded.reshape(N * row_stride, c_pad)

    # torch Conv1d weights: (C_out, C_in, K).  Stack the 3 taps along K -> (3*Cp, Cp).
    w_taps = jnp.transpose(w_dil, (2, 1, 0))                       # (3, C_in, C_out)
    w_taps = jnp.pad(w_taps, ((0, 0), (0, c_pad - C), (0, c_pad - C)))
    w_dil_k = w_taps.reshape(3 * c_pad, c_pad).astype(jnp.bfloat16)
    w_1x1_k = jnp.pad(jnp.transpose(w_1x1[:, :, 0], (1, 0)),
                      ((0, c_pad - C), (0, c_pad - C))).astype(jnp.bfloat16)
    b_dil_k = jnp.pad(b_dil, (0, c_pad - C)).reshape(1, c_pad).astype(jnp.float32)
    b_1x1_k = jnp.pad(b_1x1, (0, c_pad - C)).reshape(1, c_pad).astype(jnp.float32)

    row_align = math.gcd(math.gcd(row_stride, tile_t), 8)

    flops = 2 * N * t_pad * (3 * c_pad + c_pad) * c_pad
    bytes_accessed = (int(x_flat.size) * 4 + N * t_pad * c_pad * 4
                      + int(w_dil_k.size) * 2 + int(w_1x1_k.size) * 2
                      + 2 * c_pad * 4)

    out_ntc_pad = pl.pallas_call(
        partial(_dilated_residual_kernel, dilation=d, tile_t=tile_t,
                c_pad=c_pad, row_stride=row_stride, row_align=row_align),
        out_shape=jax.ShapeDtypeStruct((N, t_pad, c_pad), jnp.float32),
        grid_spec=pltpu.PrefetchScalarGridSpec(
            num_scalar_prefetch=0,
            grid=(N, n_t),
            in_specs=[
                pl.BlockSpec(memory_space=pl.ANY),                      # x (haloed, manual DMA)
                pl.BlockSpec((3 * c_pad, c_pad), lambda n, t: (0, 0)),  # fused dilated weight
                pl.BlockSpec((1, c_pad), lambda n, t: (0, 0)),          # dilated bias
                pl.BlockSpec((c_pad, c_pad), lambda n, t: (0, 0)),      # 1x1 weight
                pl.BlockSpec((1, c_pad), lambda n, t: (0, 0)),          # 1x1 bias
            ],
            out_specs=pl.BlockSpec((1, tile_t, c_pad), lambda n, t: (n, t, 0)),
            scratch_shapes=[
                pltpu.VMEM((2, tile_t + 2 * d, c_pad), jnp.float32),  # double-buffered x window
                pltpu.VMEM((tile_t, 3 * c_pad), jnp.bfloat16),        # fused tap slab
                pltpu.SemaphoreType.DMA((2,)),
            ]),
        compiler_params=pltpu.CompilerParams(
            dimension_semantics=("parallel", "arbitrary"),
            vmem_limit_bytes=32 * 1024 * 1024),
        cost_estimate=pl.CostEstimate(flops=flops, transcendentals=0,
                                      bytes_accessed=bytes_accessed),
    )(x_flat, w_dil_k, b_dil_k, w_1x1_k, b_1x1_k)

    return out_ntc_pad[:, :T, :C]


def dilated_residual_layer(x_nct, w_dil, b_dil, w_1x1, b_1x1, *, dilation,
                           tile_t=1024):
    """PyTorch-compatible NCT wrapper.  A multi-layer MS-TCN should stay in NTC and
    call dilated_residual_layer_ntc directly (transpose once at the model boundary)."""
    x_ntc = jnp.transpose(x_nct, (0, 2, 1))
    out_ntc = dilated_residual_layer_ntc(x_ntc, w_dil, b_dil, w_1x1, b_1x1,
                                         dilation=dilation, tile_t=tile_t)
    return jnp.transpose(out_ntc, (0, 2, 1))


def reference_forward(x, w_dil, b_dil, w_1x1, b_1x1, *, dilation):
    """Pure-JAX reference using lax.conv_general_dilated (eval-mode dropout)."""
    dn = ("NCH", "OIH", "NCH")
    h = lax.conv_general_dilated(
        x, w_dil, window_strides=(1,), padding=[(dilation, dilation)],
        rhs_dilation=(dilation,), dimension_numbers=dn)
    h = h + b_dil[None, :, None]
    h = jnp.maximum(h, 0.0)
    o = lax.conv_general_dilated(
        h, w_1x1, window_strides=(1,), padding=[(0, 0)], dimension_numbers=dn)
    o = o + b_1x1[None, :, None]
    return x + o


if __name__ == "__main__":
    N, C, T = 2, 16, 64
    dilation = 2

    key = jax.random.PRNGKey(0)
    k_x, k_w1, k_b1, k_w2, k_b2 = jax.random.split(key, 5)

    x = jax.random.normal(k_x, (N, C, T), dtype=jnp.float32)
    # Conv1d(C, C, kernel_size=3): weight (C, C, 3), bias (C,)
    w_dil = 0.1 * jax.random.normal(k_w1, (C, C, 3), dtype=jnp.float32)
    b_dil = 0.1 * jax.random.normal(k_b1, (C,), dtype=jnp.float32)
    # Conv1d(C, C, kernel_size=1): weight (C, C, 1), bias (C,)
    w_1x1 = 0.1 * jax.random.normal(k_w2, (C, C, 1), dtype=jnp.float32)
    b_1x1 = 0.1 * jax.random.normal(k_b2, (C,), dtype=jnp.float32)

    ref = reference_forward(x, w_dil, b_dil, w_1x1, b_1x1, dilation=dilation)

    # Multi-tile path (tile_t=16 -> 4 T-tiles per batch: exercises the
    # cross-grid-step DMA prefetch / double-buffer chain).
    out_multi = dilated_residual_layer(x, w_dil, b_dil, w_1x1, b_1x1,
                                       dilation=dilation, tile_t=16)
    out_multi = jax.block_until_ready(out_multi)
    assert out_multi.shape == (N, C, T)
    # Tolerance loosened vs. pure-f32: matmul inputs are bf16 (f32 accumulate).
    assert jnp.allclose(out_multi, ref, atol=5e-2, rtol=5e-2), "multi-tile mismatch"

    # Single-tile path (default tile size clamps to T).
    out_single = dilated_residual_layer(x, w_dil, b_dil, w_1x1, b_1x1,
                                        dilation=dilation)
    out_single = jax.block_until_ready(out_single)
    assert out_single.shape == (N, C, T)
    assert jnp.allclose(out_single, ref, atol=5e-2, rtol=5e-2), "single-tile mismatch"

    print("KERNEL_OK")
</pallas_src>

<mosaic_0001>
module attributes {stable_mosaic.version = 11 : i64} {
  func.func @_dilated_residual_kernel(%arg0: i32, %arg1: i32, %arg2: memref<136x128xf32, #tpu.memory_space<any>>, %arg3: memref<384x128xbf16, #tpu.memory_space<vmem>>, %arg4: memref<1x128xf32, #tpu.memory_space<vmem>>, %arg5: memref<128x128xbf16, #tpu.memory_space<vmem>>, %arg6: memref<1x128xf32, #tpu.memory_space<vmem>>, %arg7: memref<1x16x128xf32, #tpu.memory_space<vmem>>, %arg8: memref<2x20x128xf32, #tpu.memory_space<vmem>>, %arg9: memref<16x384xbf16, #tpu.memory_space<vmem>>, %arg10: memref<2x!tpu.dma_semaphore, #tpu.memory_space<semaphore_mem>>) attributes {dimension_semantics = [#tpu.dimension_semantics<parallel>, #tpu.dimension_semantics<arbitrary>], iteration_bounds = array<i64: 2, 4>, scalar_prefetch = 0 : i64, scratch_operands = 3 : i64, tpu.core_type = #tpu.core_type<tc>, window_params = [{}, {pipeline_mode = #tpu.pipeline_mode<synchronous>, transform_indices = @transform_1, window_bounds = array<i64: 384, 128>}, {pipeline_mode = #tpu.pipeline_mode<synchronous>, transform_indices = @transform_2, window_bounds = array<i64: 1, 128>}, {pipeline_mode = #tpu.pipeline_mode<synchronous>, transform_indices = @transform_3, window_bounds = array<i64: 128, 128>}, {pipeline_mode = #tpu.pipeline_mode<synchronous>, transform_indices = @transform_4, window_bounds = array<i64: 1, 128>}, {transform_indices = @transform_5, window_bounds = array<i64: 1, 16, 128>}]} {
    %c2_i32 = arith.constant 2 : i32
    %c0_i32 = arith.constant 0 : i32
    %0 = arith.cmpi eq, %c2_i32, %c0_i32 : i32
    %c1_i32 = arith.constant 1 : i32
    %1 = arith.select %0, %c1_i32, %c2_i32 : i32
    %2 = arith.remsi %arg1, %1 : i32
    %c0_i32_0 = arith.constant 0 : i32
    %3 = arith.cmpi ne, %2, %c0_i32_0 : i32
    %c0_i32_1 = arith.constant 0 : i32
    %4 = arith.cmpi slt, %2, %c0_i32_1 : i32
    %c0_i32_2 = arith.constant 0 : i32
    %5 = arith.cmpi slt, %1, %c0_i32_2 : i32
    %6 = arith.xori %4, %5 : i1
    %7 = arith.andi %6, %3 : i1
    %8 = arith.addi %2, %1 : i32
    %9 = arith.select %7, %8, %2 : i32
    %c0_i32_3 = arith.constant 0 : i32
    %10 = arith.cmpi eq, %arg1, %c0_i32_3 : i32
    %11 = arith.extui %10 : i1 to i32
    %c0_i32_4 = arith.constant 0 : i32
    %12 = arith.cmpi ne, %11, %c0_i32_4 : i32
    scf.if %12 {
      %c68_i32_38 = arith.constant 68 : i32
      %59 = arith.muli %arg0, %c68_i32_38 : i32
      %c0_i32_39 = arith.constant 0 : i32
      %60 = arith.addi %59, %c0_i32_39 : i32
      %61 = tpu.assume_multiple %60, 4 : i32
      %c0_i32_40 = arith.constant 0 : i32
      %c0_i32_41 = arith.constant 0 : i32
      %c0_i32_42 = arith.constant 0 : i32
      %62 = tpu.memref_slice %arg2[%61, %c0_i32_42] : memref<136x128xf32, #tpu.memory_space<any>> -> memref<20x128xf32, #tpu.memory_space<any>>
      %c0_i32_43 = arith.constant 0 : i32
      %c0_i32_44 = arith.constant 0 : i32
      %63 = tpu.memref_slice %arg8[%c0_i32_40, %c0_i32_43, %c0_i32_44] : memref<2x20x128xf32, #tpu.memory_space<vmem>> -> memref<1x20x128xf32, #tpu.memory_space<vmem>>
      %64 = tpu.memref_squeeze %63 : memref<1x20x128xf32, #tpu.memory_space<vmem>> -> memref<20x128xf32, #tpu.memory_space<vmem>>
      %65 = tpu.memref_slice %arg10[%c0_i32_41] : memref<2x!tpu.dma_semaphore, #tpu.memory_space<semaphore_mem>> -> memref<1x!tpu.dma_semaphore, #tpu.memory_space<semaphore_mem>>
      %66 = tpu.memref_squeeze %65 : memref<1x!tpu.dma_semaphore, #tpu.memory_space<semaphore_mem>> -> memref<!tpu.dma_semaphore, #tpu.memory_space<semaphore_mem>>
      tpu.enqueue_dma source(%62 : memref<20x128xf32, #tpu.memory_space<any>>) target(%64 : memref<20x128xf32, #tpu.memory_space<vmem>>) target_semaphore(%66 : memref<!tpu.dma_semaphore, #tpu.memory_space<semaphore_mem>>)
    } else {
    }
    %c68_i32 = arith.constant 68 : i32
    %13 = arith.muli %arg0, %c68_i32 : i32
    %c16_i32 = arith.constant 16 : i32
    %14 = arith.muli %arg1, %c16_i32 : i32
    %15 = arith.addi %13, %14 : i32
    %16 = tpu.assume_multiple %15, 4 : i32
    %c0_i32_5 = arith.constant 0 : i32
    %17 = tpu.memref_slice %arg2[%16, %c0_i32_5] : memref<136x128xf32, #tpu.memory_space<any>> -> memref<20x128xf32, #tpu.memory_space<any>>
    %c0_i32_6 = arith.constant 0 : i32
    %c0_i32_7 = arith.constant 0 : i32
    %18 = tpu.memref_slice %arg8[%9, %c0_i32_6, %c0_i32_7] : memref<2x20x128xf32, #tpu.memory_space<vmem>> -> memref<1x20x128xf32, #tpu.memory_space<vmem>>
    %19 = tpu.memref_squeeze %18 : memref<1x20x128xf32, #tpu.memory_space<vmem>> -> memref<20x128xf32, #tpu.memory_space<vmem>>
    %20 = tpu.memref_slice %arg10[%9] : memref<2x!tpu.dma_semaphore, #tpu.memory_space<semaphore_mem>> -> memref<1x!tpu.dma_semaphore, #tpu.memory_space<semaphore_mem>>
    %21 = tpu.memref_squeeze %20 : memref<1x!tpu.dma_semaphore, #tpu.memory_space<semaphore_mem>> -> memref<!tpu.dma_semaphore, #tpu.memory_space<semaphore_mem>>
    tpu.wait_dma2 semaphore(%21 : memref<!tpu.dma_semaphore, #tpu.memory_space<semaphore_mem>>) src(%17 : memref<20x128xf32, #tpu.memory_space<any>>) dst(%19 : memref<20x128xf32, #tpu.memory_space<vmem>>)
    %c1_i32_8 = arith.constant 1 : i32
    %22 = arith.addi %arg1, %c1_i32_8 : i32
    %c4_i32 = arith.constant 4 : i32
    %23 = arith.cmpi slt, %22, %c4_i32 : i32
    %24 = arith.extui %23 : i1 to i32
    %c0_i32_9 = arith.constant 0 : i32
    %25 = arith.cmpi ne, %24, %c0_i32_9 : i32
    scf.if %25 {
      %c1_i32_38 = arith.constant 1 : i32
      %59 = arith.addi %arg1, %c1_i32_38 : i32
      %c1_i32_39 = arith.constant 1 : i32
      %60 = arith.subi %c1_i32_39, %9 : i32
      %c68_i32_40 = arith.constant 68 : i32
      %61 = arith.muli %arg0, %c68_i32_40 : i32
      %c16_i32_41 = arith.constant 16 : i32
      %62 = arith.muli %59, %c16_i32_41 : i32
      %63 = arith.addi %61, %62 : i32
      %64 = tpu.assume_multiple %63, 4 : i32
      %c0_i32_42 = arith.constant 0 : i32
      %65 = tpu.memref_slice %arg2[%64, %c0_i32_42] : memref<136x128xf32, #tpu.memory_space<any>> -> memref<20x128xf32, #tpu.memory_space<any>>
      %c0_i32_43 = arith.constant 0 : i32
      %c0_i32_44 = arith.constant 0 : i32
      %66 = tpu.memref_slice %arg8[%60, %c0_i32_43, %c0_i32_44] : memref<2x20x128xf32, #tpu.memory_space<vmem>> -> memref<1x20x128xf32, #tpu.memory_space<vmem>>
      %67 = tpu.memref_squeeze %66 : memref<1x20x128xf32, #tpu.memory_space<vmem>> -> memref<20x128xf32, #tpu.memory_space<vmem>>
      %68 = tpu.memref_slice %arg10[%60] : memref<2x!tpu.dma_semaphore, #tpu.memory_space<semaphore_mem>> -> memref<1x!tpu.dma_semaphore, #tpu.memory_space<semaphore_mem>>
      %69 = tpu.memref_squeeze %68 : memref<1x!tpu.dma_semaphore, #tpu.memory_space<semaphore_mem>> -> memref<!tpu.dma_semaphore, #tpu.memory_space<semaphore_mem>>
      tpu.enqueue_dma source(%65 : memref<20x128xf32, #tpu.memory_space<any>>) target(%67 : memref<20x128xf32, #tpu.memory_space<vmem>>) target_semaphore(%69 : memref<!tpu.dma_semaphore, #tpu.memory_space<semaphore_mem>>)
    } else {
    }
    %c0_i32_10 = arith.constant 0 : i32
    %c0_i32_11 = arith.constant 0 : i32
    %26 = tpu.memref_slice %arg8[%9, %c0_i32_10, %c0_i32_11] : memref<2x20x128xf32, #tpu.memory_space<vmem>> -> memref<1x20x128xf32, #tpu.memory_space<vmem>>
    %27 = tpu.memref_squeeze %26 : memref<1x20x128xf32, #tpu.memory_space<vmem>> -> memref<20x128xf32, #tpu.memory_space<vmem>>
    %c2 = arith.constant 2 : index
    %c0 = arith.constant 0 : index
    %28 = vector.load %27[%c2, %c0] : memref<20x128xf32, #tpu.memory_space<vmem>>, vector<16x128xf32>
    %c0_i32_12 = arith.constant 0 : i32
    %c0_i32_13 = arith.constant 0 : i32
    %29 = tpu.memref_slice %arg8[%9, %c0_i32_12, %c0_i32_13] : memref<2x20x128xf32, #tpu.memory_space<vmem>> -> memref<1x20x128xf32, #tpu.memory_space<vmem>>
    %30 = tpu.memref_squeeze %29 : memref<1x20x128xf32, #tpu.memory_space<vmem>> -> memref<20x128xf32, #tpu.memory_space<vmem>>
    %c0_14 = arith.constant 0 : index
    %c0_15 = arith.constant 0 : index
    %31 = vector.load %30[%c0_14, %c0_15] : memref<20x128xf32, #tpu.memory_space<vmem>>, vector<16x128xf32>
    %32 = arith.truncf %31 : vector<16x128xf32> to vector<16x128xbf16>
    %c0_16 = arith.constant 0 : index
    %c0_17 = arith.constant 0 : index
    %33 = vector.load %arg9[%c0_16, %c0_17] : memref<16x384xbf16, #tpu.memory_space<vmem>>, vector<16x128xbf16>
    tpu.vector_store %arg9[%c0_16, %c0_17], %32 {strides = array<i32>} : memref<16x384xbf16, #tpu.memory_space<vmem>>, vector<16x128xbf16>,
    %34 = arith.truncf %28 : vector<16x128xf32> to vector<16x128xbf16>
    %c0_18 = arith.constant 0 : index
    %c128 = arith.constant 128 : index
    %35 = vector.load %arg9[%c0_18, %c128] : memref<16x384xbf16, #tpu.memory_space<vmem>>, vector<16x128xbf16>
    tpu.vector_store %arg9[%c0_18, %c128], %34 {strides = array<i32>} : memref<16x384xbf16, #tpu.memory_space<vmem>>, vector<16x128xbf16>,
    %c0_i32_19 = arith.constant 0 : i32
    %c0_i32_20 = arith.constant 0 : i32
    %36 = tpu.memref_slice %arg8[%9, %c0_i32_19, %c0_i32_20] : memref<2x20x128xf32, #tpu.memory_space<vmem>> -> memref<1x20x128xf32, #tpu.memory_space<vmem>>
    %37 = tpu.memref_squeeze %36 : memref<1x20x128xf32, #tpu.memory_space<vmem>> -> memref<20x128xf32, #tpu.memory_space<vmem>>
    %c4 = arith.constant 4 : index
    %c0_21 = arith.constant 0 : index
    %38 = vector.load %37[%c4, %c0_21] : memref<20x128xf32, #tpu.memory_space<vmem>>, vector<16x128xf32>
    %39 = arith.truncf %38 : vector<16x128xf32> to vector<16x128xbf16>
    %c0_22 = arith.constant 0 : index
    %c256 = arith.constant 256 : index
    %40 = vector.load %arg9[%c0_22, %c256] : memref<16x384xbf16, #tpu.memory_space<vmem>>, vector<16x128xbf16>
    tpu.vector_store %arg9[%c0_22, %c256], %39 {strides = array<i32>} : memref<16x384xbf16, #tpu.memory_space<vmem>>, vector<16x128xbf16>,
    %c0_23 = arith.constant 0 : index
    %c0_24 = arith.constant 0 : index
    %41 = vector.load %arg9[%c0_23, %c0_24] : memref<16x384xbf16, #tpu.memory_space<vmem>>, vector<16x384xbf16>
    %c0_25 = arith.constant 0 : index
    %c0_26 = arith.constant 0 : index
    %42 = vector.load %arg3[%c0_25, %c0_26] : memref<384x128xbf16, #tpu.memory_space<vmem>>, vector<384x128xbf16>
    %cst = arith.constant dense<0.000000e+00> : vector<16x128xf32>
    %43 = tpu.matmul %41, %42, %cst {dimension_numbers = #tpu.dot_dimension_numbers<[1], [0], [0], [1], [0, 0, 1, 1], [], []>} : vector<16x384xbf16>, vector<384x128xbf16>, vector<16x128xf32> -> vector<16x128xf32>
    %c0_27 = arith.constant 0 : index
    %c0_28 = arith.constant 0 : index
    %44 = vector.load %arg4[%c0_27, %c0_28] : memref<1x128xf32, #tpu.memory_space<vmem>>, vector<1x128xf32>
    %45 = vector.broadcast %44 : vector<1x128xf32> to vector<16x128xf32>
    %46 = arith.addf %43, %45 : vector<16x128xf32>
    %cst_29 = arith.constant 0.000000e+00 : f32
    %47 = vector.broadcast %cst_29 : f32 to vector<16x128xf32>
    %48 = arith.maximumf %46, %47 : vector<16x128xf32>
    %49 = arith.truncf %48 : vector<16x128xf32> to vector<16x128xbf16>
    %c0_30 = arith.constant 0 : index
    %c0_31 = arith.constant 0 : index
    %50 = vector.load %arg5[%c0_30, %c0_31] : memref<128x128xbf16, #tpu.memory_space<vmem>>, vector<128x128xbf16>
    %cst_32 = arith.constant dense<0.000000e+00> : vector<16x128xf32>
    %51 = tpu.matmul %49, %50, %cst_32 {dimension_numbers = #tpu.dot_dimension_numbers<[1], [0], [0], [1], [0, 0, 1, 1], [], []>} : vector<16x128xbf16>, vector<128x128xbf16>, vector<16x128xf32> -> vector<16x128xf32>
    %c0_33 = arith.constant 0 : index
    %c0_34 = arith.constant 0 : index
    %52 = vector.load %arg6[%c0_33, %c0_34] : memref<1x128xf32, #tpu.memory_space<vmem>>, vector<1x128xf32>
    %53 = vector.broadcast %52 : vector<1x128xf32> to vector<16x128xf32>
    %54 = arith.addf %51, %53 : vector<16x128xf32>
    %55 = arith.addf %28, %54 : vector<16x128xf32>
    %c0_35 = arith.constant 0 : index
    %c0_36 = arith.constant 0 : index
    %c0_37 = arith.constant 0 : index
    %56 = vector.load %arg7[%c0_35, %c0_36, %c0_37] : memref<1x16x128xf32, #tpu.memory_space<vmem>>, vector<1x16x128xf32>
    %57 = vector.shape_cast %56 : vector<1x16x128xf32> to vector<16x128xf32>
    %58 = vector.shape_cast %55 : vector<16x128xf32> to vector<1x16x128xf32>
    tpu.vector_store %arg7[%c0_35, %c0_36, %c0_37], %58 {strides = array<i32>} : memref<1x16x128xf32, #tpu.memory_space<vmem>>, vector<1x16x128xf32>,
    return
  }
  func.func @transform_1(%arg0: i32, %arg1: i32) -> (i32, i32) {
    %c0_i32 = arith.constant 0 : i32
    %c0_i32_0 = arith.constant 0 : i32
    %c0_i32_1 = arith.constant 0 : i32
    return %c0_i32, %c0_i32_0 : i32, i32
  }
  func.func @transform_2(%arg0: i32, %arg1: i32) -> (i32, i32) {
    %c0_i32 = arith.constant 0 : i32
    %c0_i32_0 = arith.constant 0 : i32
    %c0_i32_1 = arith.constant 0 : i32
    return %c0_i32, %c0_i32_0 : i32, i32
  }
  func.func @transform_3(%arg0: i32, %arg1: i32) -> (i32, i32) {
    %c0_i32 = arith.constant 0 : i32
    %c0_i32_0 = arith.constant 0 : i32
    %c0_i32_1 = arith.constant 0 : i32
    return %c0_i32, %c0_i32_0 : i32, i32
  }
  func.func @transform_4(%arg0: i32, %arg1: i32) -> (i32, i32) {
    %c0_i32 = arith.constant 0 : i32
    %c0_i32_0 = arith.constant 0 : i32
    %c0_i32_1 = arith.constant 0 : i32
    return %c0_i32, %c0_i32_0 : i32, i32
  }
  func.func @transform_5(%arg0: i32, %arg1: i32) -> (i32, i32, i32) {
    %c0_i32 = arith.constant 0 : i32
    %c0_i32_0 = arith.constant 0 : i32
    return %arg0, %arg1, %c0_i32 : i32, i32, i32
  }
}

</mosaic_0001>

<bundles_post_ra>
// kernel: tpu_custom_call.1
= control target key start
LH: loop header
LB: loop body
LE: loop exit
PB: predicated region body
PF: predicated region fallthrough
CT: control target
= control target key end

     0   :  { %s1714_s0 = inlined_call_operand.hbm [shape: f32[136,128], index: 0, kind: input, shape index: {}]   ;;  %s1715_s1 = inlined_call_operand.hbm [shape: bf16[384,128], index: 1, kind: input, shape index: {}]   ;;  %s1716_s2 = inlined_call_operand.vmem [shape: f32[1,128], index: 2, kind: input, shape index: {}]   ;;  %s1717_s3 = inlined_call_operand.hbm [shape: bf16[128,128], index: 3, kind: input, shape index: {}]   ;;  %s1718_s4 = inlined_call_operand.vmem [shape: f32[1,128], index: 4, kind: input, shape index: {}]   ;;  %s1719_s5 = inlined_call_operand.hbm [shape: f32[2,64,128], index: 5, kind: output, shape index: {}]  }
   0x1   :  { %1728 = sst [smem:[#allocation27_spill]] %s1715_s1 }
   0x2   :  { %1729 = sst [smem:[#allocation28_spill]] %s1717_s3 }
   0x3   :  { %10 = vsyncpa [#allocation6], 0 }
   0x4   :  { %11 = vsyncpa [#allocation9], 0 }
   0x5   :  { %12 = vsyncpa [#allocation7], 0 }
   0x6   :  { %14 = vsyncpa [#allocation7 + $0x1], 0  ;;  %s1418_s18 = smov 0   ;;  %s1420_s19 = smov 0  }
   0x7   :  { %s1422_s20 = smov 0   ;;  %s1424_s21 = smov 0  }
   0x8   :  { %s1426_s22 = smov 0   ;;  %s1428_s23 = smov 0  }
   0x9   :  { %s1430_s24 = smov 0   ;;  %s1432_s25 = smov 0  }
   0xa LB: > { %1730 = sst [smem:[#allocation21_spill]] %s1356_s20  ;;  %s871_s26 = sadd.s32 4294967295, %s1376_s25   ;;  %s1376_s25 = sphi %s1432_s25, %s20_s25   ;;  %s1372_s24 = sphi %s1430_s24, %s1753_s24   ;;  %s1368_s23 = sphi %s1428_s23, %s1752_s23   ;;  %s1364_s22 = sphi %s1426_s22, %s1751_s22   ;;  %s1360_s21 = sphi %s1424_s21, %s1750_s21   ;;  %s1356_s20 = sphi %s1422_s20, %s1749_s20   ;;  %s1352_s19 = sphi %s1420_s19, %s1755_s19   ;;  %s1348_s18 = sphi %s1418_s18, %s1754_s18  }
   0xb   : > { %1731 = sst [smem:[#allocation22_spill]] %s1368_s23  ;;  %s872_s27 = sadd.s32 4294967294, %s1376_s25  }
   0xc   : > { %1732 = sst [smem:[#allocation23_spill]] %s1372_s24  ;;  %s29_s28 = sadd.s32 1, %s1368_s23 }
   0xd   : > { %s32_s29 = sadd.s32 1, %s1372_s24  ;;  %p30_p0 = scmp.ge.s32.totalorder %s29_s28, 4 }
   0xe   : > { %s125_s30 = sadd.s32 1, %s1356_s20  ;;  %p135_p1 = scmp.ne.s32.totalorder %s1356_s20, %s1352_s19 }
   0xf   : > { %p136_p2 = scmp.eq.s32.totalorder %s871_s26, 7  ;;  %s1757_s28 = smov (%p30_p0, %s29_s28), 0 }
  0x10   : > { %1733 = sst [smem:[#allocation24_spill]] %s1757_s28  ;;  %s1759_s29 = smov (!%p30_p0, %s32_s29), %s1372_s24 }
  0x11   : > { %s121_s6 = ssub.s32 %s1368_s23, %s1757_s28  ;;  %p1470_p3 = por %p136_p2, %p135_p1 }
  0x12   : > { %p34_p4 = scmp.ge.s32.totalorder %s1759_s29, 2  ;;  %p141_p5 = scmp.ne.s32.totalorder %s1352_s19, %s1348_s18 }
  0x13   : > { %p142_p6 = scmp.eq.s32.totalorder %s872_s27, 7  ;;  %p873_p7 = scmp.ge.s32.totalorder %s1376_s25, 1 }
  0x14   : > { %s1761_s29 = smov (%p34_p4, %s1759_s29), 0  ;;  %p149_p9 = scmp.lt.s32.totalorder %s1376_s25, 9 }
  0x15   : > { %1735 = sst [smem:[#allocation25_spill]] %s1761_s29  ;;  %p1479_p8 = por %p142_p6, %p141_p5 }
  0x16   : > { %s120_s9 = ssub.s32 %s1372_s24, %s1761_s29  ;;  %p1486_p10 = pnand %p873_p7, %p149_p9 }
  0x17   : > { %s1736_s8 = scalar_select %p1479_p8, 1, 0 }
  0x18   : > { %s122_s10 = sor.u32 %s121_s6, %s120_s9  ;;  %p1490_p12 = scmp.eq.s32.totalorder %s871_s26, 0 }
  0x19   : > { %p123_p11 = scmp.eq.s32.totalorder %s122_s10, 0  ;;  %p1045_p13 = pneg %p1486_p10 }
  0x1a   : > { %s1378_s14 = smov [#allocation5]  }
  0x1b   : > { %s1497_s13 = scalar_select %p123_p11, %s1356_s20, %s125_s30  }
  0x1c   : > { %s161_s15 = sshll.u32 %s1378_s14, 4  ;;  %p1501_p0 = pnand %p1490_p12, %p1045_p13  ;;  %s162_s15 = int_to_ptr.vmem [resolvable:$true] %s161_s15 }
  0x1d   : > { %1739 = sst [smem:[#allocation26_spill]] %s1497_s13  ;;  %s1180_s17 = scalar_lea.vmem %s162_s15, 3072 }
  0x1e   : > { %p1171_p1 = pneg %p1501_p0  ;;  %p1181_p2 = scmp.ne.s32.totalorder %s162_s15, %s1180_s17 }
  0x1f   : > { %p1188_p6 = scmp.lt.s32.totalorder %s162_s15, %s162_s15  ;;  %p1189_p7 = scmp.lt.s32.totalorder %s1180_s17, %s1180_s17 }
  0x20   : > { %p1183_p4 = pnand %p1181_p2, %p1171_p1 }
  0x21   : > { %p1190_p9 = por %p1189_p7, %p1188_p6 }
  0x22   : > { %p1184_p5 = pneg %p1183_p4 }
  0x24   : > { %p1191_p11 = pnand %p1190_p9, %p1184_p5 }
  0x26   : > { %1194 = shalt.err (!%p1191_p11)
}
  0x27   : > { %s1379_s26 = smov 64   ;;  %s1380_s27 = smov 4  }
  0x28   : > { %s1741_s1 = sld [smem:[#allocation27_spill]]  ;;  %s1381_s9 = smov [#allocation8]  }
  0x29   : > { %s177_s10 = sshll.u32 %s1381_s9, 4  ;;  %s178_s10 = int_to_ptr.vmem [resolvable:$true] %s177_s10 }
  0x2a   : > { %s1206_s14 = scalar_lea.vmem %s178_s10, 1024  ;;  %p1214_p5 = scmp.lt.s32.totalorder %s178_s10, %s178_s10 }
  0x2b   : > { %p1207_p13 = scmp.ne.s32.totalorder %s178_s10, %s1206_s14  ;;  %p1215_p6 = scmp.lt.s32.totalorder %s1206_s14, %s1206_s14 }
  0x2d   : > { %p1209_p2 = pnand %p1207_p13, %p1171_p1  ;;  %p1216_p7 = por %p1215_p6, %p1214_p5 }
  0x2e   : > { %1048 = dma.hbm_to_vmem [thread:$0]  (!%p1501_p0), %s1741_s1, 3072, %s162_s15, [#allocation6], %s1379_s26, %s1379_s26, %s1380_s27  }
  0x2f   : > { %p1210_p4 = pneg %p1209_p2 }
  0x31   : > { %p1217_p9 = pnand %p1216_p7, %p1210_p4 }
  0x33   : > { %1220 = shalt.err (!%p1217_p9)
}
  0x34   : > { %s1742_s3 = sld [smem:[#allocation28_spill]] }
  0x36   : > { %196 = sbr.rel (%p1486_p10) target bundleno = 576 (0x240), region = 36 }
  0x3a   : > { %1051 = dma.hbm_to_vmem [thread:$0]  (!%p1501_p0), %s1742_s3, 1024, %s178_s10, [#allocation9], %s1379_s26, %s1379_s26, %s1380_s27  }
  0x3b   : > { %1333 = dma.done.wait (%p1490_p12), [#allocation6], 3072  }
  0x3c   : > { %1335 = vsyncadd (%p1490_p12), [#allocation6], 4294964224 }
  0x3d   : > { %1337 = dma.done.wait (%p1490_p12), [#allocation9], 1024  }
  0x3e   : > { %1339 = vsyncadd (%p1490_p12), [#allocation9], 4294966272  ;;  %s1721_s29 = sand.u32 1, %s1352_s19   ;;  %p223_p10 = scmp.lt.s32.totalorder %s1360_s21, 0 }
  0x3f   : > { %s1537_s11 = sshll.u32 %s1721_s29, 4  ;;  %s224_s15 = ssub.s32 0, %s1360_s21 }
  0x40   : > { %s880_s16 = smin.u32 %s1360_s21, %s224_s15  ;;  %p1060_p0 = scmp.eq.s32.totalorder %s1360_s21, 0 }
  0x41   : > { %s226_s26 = sand.u32 1, %s880_s16   ;;  %s939_s12 = smul.u32 1088, %s1364_s22 }
  0x42   : > { %s227_s27 = ssub.s32 0, %s226_s26  ;;  %s1382_s14 = smov [#allocation2]  }
  0x43   : > { %s1763_s27 = smov (!%p223_p10, %s227_s27), %s226_s26  ;;  %s241_s10 = scalar_lea.hbm %s1714_s0, %s939_s12 }
  0x44   : > { %p882_p12 = scmp.lt.s32.totalorder %s1763_s27, 0  ;;  %s233_s30 = sadd.s32 2, %s1763_s27 }
  0x45   : > { %s249_s17 = sshll.u32 %s1382_s14, 4  ;;  %s1221_s29 = scalar_lea.hbm %s241_s10, 320  ;;  %s1548_s17 = int_to_ptr.vmem [resolvable:$true] %s249_s17 }
  0x46   : > { %s1765_s30 = smov (!%p882_p12, %s233_s30), %s1763_s27  ;;  %p1222_p1 = scmp.ne.s32.totalorder %s241_s10, %s1221_s29 }
  0x47   : > { %s1723_s26 = scalar_lea.hbm %s1714_s0, 2176  ;;  %p1226_p2 = scmp.lt.s32.totalorder %s241_s10, %s1714_s0 }
  0x48   : > { %p1223_p11 = pnand %p1222_p1, %p1060_p0  ;;  %p1227_p4 = scmp.lt.s32.totalorder %s1723_s26, %s1221_s29 }
  0x4a   : > { %p1224_p13 = pneg %p1223_p11  ;;  %p1228_p5 = por %p1227_p4, %p1226_p2 }
  0x4c   : > { %p1229_p6 = pnand %p1228_p5, %p1224_p13 }
  0x4e   : > { %1232 = shalt.err (!%p1229_p6)  }
  0x4f   : > { %s1233_s27 = scalar_lea.vmem %s1548_s17, 320  ;;  %s1722_s1 = scalar_lea.vmem %s1548_s17, 768 }
  0x50   : > { %p1234_p7 = scmp.ne.s32.totalorder %s1548_s17, %s1233_s27  ;;  %p1240_p12 = scmp.lt.s32.totalorder %s1548_s17, %s1548_s17 }
  0x51   : > { %p1241_p1 = scmp.lt.s32.totalorder %s1722_s1, %s1233_s27 }
  0x52   : > { %p1235_p9 = pnand %p1234_p7, %p1060_p0 }
  0x53   : > { %p1242_p11 = por %p1241_p1, %p1240_p12 }
  0x54   : > { %p1236_p10 = pneg %p1235_p9 }
  0x56   : > { %p1243_p2 = pnand %p1242_p11, %p1236_p10 }
  0x58   : > { %1246 = shalt.err (!%p1243_p2)  }
  0x59   : > { %1040 = dma.hbm_to_vmem [thread:$0]  (%p1060_p0), %s241_s10, 320, %s1548_s17, [#allocation4] }
  0x5a   : > { %s256_s3 = smul.u32 24, %s1765_s30  ;;  %s1576_s29 = scalar_lea.vmem [#allocation10], %s1537_s11 }
  0x5b   : > { %s258_s14 = scalar_lea.sflag [#allocation4], %s1765_s30 }
  0x5c   : > { %s1578_s9 = scalar_lea.vmem [#allocation2], %s256_s3 }
  0x5d   : > { %1340 = dma.done.wait %s258_s14, 320 }
  0x5e   : > { %1341 = vsyncadd %s258_s14, 4294966976  ;;  %s262_s15 = sadd.s32 1, %s1360_s21  ;;  %s267_s16 = ssub.s32 1, %s1765_s30  ;;  %v1383_v0 = vmov 0.0   ;;  %vm1384_vm0 = vmmov 0   ;;  %v1136_v1 = vld [vmem:[#allocation5 + $0x78] sm:$0xff]  }
  0x5f   : > { %991 = vmatprep.subr.bf16.mxu1 %v1383_v0  ;;  %1007 = vmatprep.mubr.msk.bf16.mxu1 %vm1384_vm0, %v1383_v0  ;;  %s807_s11 = smul.u32 68, %s1364_s22  ;;  %s886_s10 = sshll.u32 %s1360_s21, 4  ;;  %v1137_v2 = vld [vmem:[#allocation5 + $0x38] sm:$0xff]  }
  0x60   : > { %p1588_p0 = scmp.lt.s32.totalorder %s262_s15, 4  ;;  %s272_s6 = smul.u32 24, %s267_s16 }
  0x61   : > { %s809_s27 = sadd.s32 %s886_s10, %s807_s11  ;;  %s274_s23 = scalar_lea.sflag [#allocation4], %s267_s16 }
  0x62   : > { %s887_s3 = sshll.u32 %s809_s27, 4  ;;  %s273_s26 = scalar_lea.vmem [#allocation2], %s272_s6 }
  0x63   : > { %s811_s30 = scalar_lea.hbm %s1714_s0, %s887_s3  ;;  %s282_s28 = sshll.u32 %s273_s26, 4  ;;  %s283_s28 = int_to_ptr.vmem [resolvable:$true] %s282_s28 }
  0x64   : > { %s812_s24 = scalar_lea.hbm %s811_s30, 256  ;;  %s1273_s13 = scalar_lea.hbm %s811_s30, 576 }
  0x65   : > { %p1248_p13 = scmp.ne.s32.totalorder %s812_s24, %s1273_s13  ;;  %p1252_p6 = scmp.lt.s32.totalorder %s812_s24, %s1714_s0 }
  0x66   : > { %s1744_s1 = scalar_lea.hbm %s1714_s0, 2176 }
  0x67   : > { %p1249_p4 = pnand %p1248_p13, %p1588_p0  ;;  %p1253_p7 = scmp.lt.s32.totalorder %s1744_s1, %s1273_s13 }
  0x69   : > { %p1250_p5 = pneg %p1249_p4  ;;  %p1254_p9 = por %p1253_p7, %p1252_p6 }
  0x6b   : > { %p1255_p10 = pnand %p1254_p9, %p1250_p5 }
  0x6d   : > { %1258 = shalt.err (!%p1255_p10)  }
  0x6e   : > { %s1259_s26 = scalar_lea.vmem %s283_s28, 320  ;;  %p1266_p2 = scmp.lt.s32.totalorder %s283_s28, %s1548_s17 }
  0x6f   : > { %p1260_p12 = scmp.ne.s32.totalorder %s283_s28, %s1259_s26  ;;  %s1745_s16 = scalar_lea.vmem %s1548_s17, 768 }
  0x70   : > { %p1267_p13 = scmp.lt.s32.totalorder %s1745_s16, %s1259_s26 }
  0x71   : > { %p1261_p1 = pnand %p1260_p12, %p1588_p0 }
  0x72   : > { %p1268_p4 = por %p1267_p13, %p1266_p2 }
  0x73   : > { %p1262_p11 = pneg %p1261_p1 }
  0x75   : > { %p1269_p8 = pnand %p1268_p4, %p1262_p11 }
  0x77   : > { %1272 = shalt.err (!%p1269_p8)  }
  0x78   : > { %1042 = dma.hbm_to_vmem [thread:$0]  (%p1588_p0), %s812_s24, 320, %s283_s28, %s274_s23  ;;  %951 = vmatprep.subr.bf16.mxu0 %v1136_v1  ;;  %v1138_v3 = vld [vmem:[#allocation5 + $0xb8] sm:$0xff]   ;;  %v1139_v4 = vld [vmem:[#allocation5 + $0x70] sm:$0xff]   ;;  %v1142_v7 = vld [vmem:[#allocation5 + $0x68] sm:$0xff]  }
  0x79   : > { %952 = vmatpush3.bf16.msra.mxu0 %v1137_v2  ;;  %992 = vmatpush3.bf16.msra.mxu1 %v1138_v3  ;;  %v1140_v5 = vld [vmem:[#allocation5 + $0x30] sm:$0xff]   ;;  %v1143_v8 = vld [vmem:[#allocation5 + $0x28] sm:$0xff]   ;;  %v1145_v10 = vld [vmem:[#allocation5 + $0x60] sm:$0xff]   ;;  %s932_s24 = sshll.u32 %s1360_s21, 1  ;;  %s933_s28 = sshll.u32 %s1364_s22, 3 }
  0x7a   : > { %953 = vmatprep.subr.bf16.mxu0 %v1139_v4  ;;  %993 = vmatprep.subr.bf16.mxu1 %v1383_v0  ;;  %v1141_v6 = vld [vmem:[#allocation5 + $0xb0] sm:$0xff]   ;;  %v1144_v9 = vld [vmem:[#allocation5 + $0xa8] sm:$0xff]   ;;  %v1146_v11 = vld [vmem:[#allocation5 + $0x20] sm:$0xff]   ;;  %s758_s6 = sshll.u32 %s1576_s29, 4  ;;  %s1746_s3 = sand.u32 1, %s1352_s19   ;;  %s1657_s6 = int_to_ptr.vmem [resolvable:$true] %s758_s6 }
  0x7b   : > { %v1147_v12 = vld [vmem:[#allocation5 + $0xa0] sm:$0xff]   ;;  %v1148_v13 = vld [vmem:[#allocation5 + $0x58] sm:$0xff]   ;;  %v1151_v16 = vld [vmem:[#allocation5 + $0x50] sm:$0xff]   ;;  %s1663_s14 = scalar_lea.sflag [#allocation7], %s1746_s3  ;;  %s1274_s30 = scalar_lea.vmem %s1657_s6, 256 }
  0x7c   : > { %v1149_v14 = vld [vmem:[#allocation5 + $0x18] sm:$0xff]   ;;  %v1152_v17 = vld [vmem:[#allocation5 + $0x10] sm:$0xff]   ;;  %v1154_v19 = vld [vmem:[#allocation5 + $0x48] sm:$0xff]   ;;  %p1275_p8 = scmp.ne.s32.totalorder %s1657_s6, %s1274_s30  ;;  %s1385_s15 = smov [#allocation10]  }
  0x7d   : > { %954 = vmatpush3.bf16.msra.mxu0 %v1140_v5  ;;  %994 = vmatpush3.bf16.msra.mxu1 %v1141_v6  ;;  %v1150_v15 = vld [vmem:[#allocation5 + $0x98] sm:$0xff]   ;;  %v1153_v18 = vld [vmem:[#allocation5 + $0x90] sm:$0xff]   ;;  %v1155_v20 = vld [vmem:[#allocation5 + $0x8] sm:$0xff]   ;;  %s1278_s11 = sshll.u32 %s1385_s15, 4  ;;  %s1279_s11 = int_to_ptr.vmem [resolvable:$false] %s1278_s11 }
  0x7e   : > { %955 = vmatprep.subr.bf16.mxu0 %v1142_v7  ;;  %995 = vmatprep.subr.bf16.mxu1 %v1383_v0  ;;  %v1156_v21 = vld [vmem:[#allocation5 + $0x88] sm:$0xff]   ;;  %v1157_v22 = vld [vmem:[#allocation5 + $0x40] sm:$0xff]   ;;  %v288_v25 = vld [vmem:[%s1578_s9] sm:$0xff]  ;;  %p1276_p0 = pnand %p1275_p8, %p1470_p3  ;;  %s1280_s10 = scalar_lea.vmem %s1279_s11, 512 }
  0x7f   : > { %v1617_v23 = vld [vmem:[%s1578_s9 + $0x2] sm:$0xff]  ;;  %v1620_v24 = vld [vmem:[%s1578_s9 + $0xa] sm:$0xff]  ;;  %p1281_p6 = scmp.lt.s32.totalorder %s1657_s6, %s1279_s11  ;;  %p1282_p7 = scmp.lt.s32.totalorder %s1280_s10, %s1274_s30 }
  0x80   : > { %v289_v26 = vld [vmem:[%s1578_s9 + $0x8] sm:$0xff]  ;;  %v943_v27 = vpack.c.bf16 %v1620_v24, %v1620_v24  ;;  %v949_v28 = vpack.c.bf16 %v1617_v23, %v288_v25  ;;  %v1162_v41 = vld [vmem:[#allocation8 + $0x30] sm:$0xff]   ;;  %v1163_v42 = vld [vmem:[#allocation8 + $0x28] sm:$0xff]   ;;  %p1277_p5 = pneg %p1276_p0 }
  0x81   : > { %956 = vmatpush3.bf16.msra.mxu0 %v1143_v8  ;;  %996 = vmatpush3.bf16.msra.mxu1 %v1144_v9  ;;  %v310_v29 = vld [vmem:[%s1578_s9 + $0x4] sm:$0xff]  ;;  %v311_v30 = vld [vmem:[%s1578_s9 + $0xc] sm:$0xff]  ;;  %v941_v31 = vpack.c.bf16 %v289_v26, %v289_v26  ;;  %s755_s9 = sadd.s32 %s933_s28, %s932_s24  ;;  %p1283_p9 = por %p1282_p7, %p1281_p6 }
  0x82   : > { %957 = vmatprep.subr.bf16.mxu0 %v1145_v10  ;;  %997 = vmatprep.subr.bf16.mxu1 %v1383_v0  ;;  %v944_v32 = vpack.c.bf16 %v310_v29, %v310_v29  ;;  %v945_v33 = vpack.c.bf16 %v311_v30, %v311_v30  ;;  %v1158_v34 = vld [vmem:[#allocation5] sm:$0xff]   ;;  %309 = vst [vmem:[#allocation3 + $0x10] sm:$0xf] %v943_v27  ;;  %v1161_v40 = vld [vmem:[#allocation8 + $0x38] sm:$0xff]   ;;  %v1166_v45 = vld [vmem:[#allocation8 + $0x10] sm:$0xff]   ;;  %s934_s12 = sshll.u32 %s755_s9, 7 }
  0x83   : > { %v1159_v35 = vld [vmem:[#allocation5 + $0x80] sm:$0xff]   ;;  %299 = vst [vmem:[#allocation3 + $0xc] sm:$0xf] %v941_v31  ;;  %v1165_v44 = vld [vmem:[#allocation8 + $0x18] sm:$0xff]   ;;  %v1167_v46 = vld [vmem:[#allocation8 + $0x8] sm:$0xff]   ;;  %s1655_s27 = scalar_lea.hbm %s1719_s5, %s934_s12  ;;  %p1284_p10 = pnand %p1283_p9, %p1277_p5 }
  0x84   : > { %320 = vst [vmem:[#allocation3 + $0x8] sm:$0xf] %v944_v32  ;;  %321 = vst [vmem:[#allocation3 + $0x14] sm:$0xf] %v945_v33  ;;  %v1164_v43 = vld [vmem:[#allocation8 + $0x20] sm:$0xff]  }
  0x85   : > { %958 = vmatpush3.bf16.msra.mxu0 %v1146_v11  ;;  %998 = vmatpush3.bf16.msra.mxu1 %v1147_v12  ;;  %v1168_v47 = vld [vmem:[#allocation8] sm:$0xff]   ;;  %v894_v51 = vld [vmem:[%s1716_s2] ss:$0 sm:$0xff] }
  0x86   : > { %959 = vmatprep.subr.bf16.mxu0 %v1148_v13  ;;  %999 = vmatprep.subr.bf16.mxu1 %v1383_v0  ;;  %v922_v2 = vld [vmem:[%s1718_s4] ss:$0 sm:$0xff] }
  0x89   : > { %960 = vmatpush3.bf16.msra.mxu0 %v1149_v14  ;;  %1000 = vmatpush3.bf16.msra.mxu1 %v1150_v15 }
  0x8a   : > { %961 = vmatprep.subr.bf16.mxu0 %v1151_v16  ;;  %1001 = vmatprep.subr.bf16.mxu1 %v1383_v0  ;;  %v324_v36 = vld [vmem:[#allocation3 + $0xc] sm:$0xff] }
  0x8b   : > { %v895_v37 = vcombine.low %v949_v28, %v324_v36  ;;  %v896_v38 = vcombine.high %v949_v28, %v324_v36  ;;  %v1160_v39 = vld [vmem:[#allocation3 + $0x8] ss:$12 sps:$4 sm:$0xff]  }
  0x8d   : > { %962 = vmatpush3.bf16.msra.mxu0 %v1152_v17  ;;  %1002 = vmatpush3.bf16.msra.mxu1 %v1153_v18 }
  0x8e   : > { %963 = vmatprep.subr.bf16.mxu0 %v1154_v19  ;;  %1003 = vmatprep.subr.bf16.mxu1 %v1383_v0 }
  0x8f   : > { %573 = vmatprep.mubr.bf16.mxu0 %v896_v38 }
  0x91   : > { %964 = vmatpush3.bf16.msra.mxu0 %v1155_v20  ;;  %1004 = vmatpush3.bf16.msra.mxu1 %v1156_v21 }
  0x92   : > { %965 = vmatprep.subr.bf16.mxu0 %v1157_v22  ;;  %1005 = vmatprep.subr.bf16.mxu1 %v1383_v0 }
  0x95   : > { %966 = vmatpush3.bf16.msra.mxu0 %v1158_v34  ;;  %1006 = vmatpush3.bf16.msra.mxu1 %v1159_v35 }
  0x96   : > { %1011 = vmatprep.subr.bf16.mxu0 %v1383_v0 }
  0x98   : > { %1008 = vmatmul.mubr.bf16.vlgmr.msra.gmra.mxu1 %v1160_v39  ;;  %574 = vmatmul.mubr.bf16.vlgmr.msra.gmra.mxu0 %v895_v37 }
  0x99   : > { %1012 = vmatpush3.bf16.msra.mxu0 %v1161_v40  ;;  %1027 = vmatprep.mubr.msk.bf16.mxu0 %vm1384_vm0, %v1383_v0 }
  0x9a   : > { %1013 = vmatprep.subr.bf16.mxu0 %v1383_v0 }
  0x9d   : > { %1014 = vmatpush3.bf16.msra.mxu0 %v1162_v41 }
  0x9e   : > { %1015 = vmatprep.subr.bf16.mxu0 %v1383_v0 }
  0xa1   : > { %1016 = vmatpush3.bf16.msra.mxu0 %v1163_v42 }
  0xa2   : > { %1017 = vmatprep.subr.bf16.mxu0 %v1383_v0 }
  0xa5   : > { %1018 = vmatpush3.bf16.msra.mxu0 %v1164_v43 }
  0xa6   : > { %1019 = vmatprep.subr.bf16.mxu0 %v1383_v0 }
  0xa9   : > { %1020 = vmatpush3.bf16.msra.mxu0 %v1165_v44 }
  0xaa   : > { %1021 = vmatprep.subr.bf16.mxu0 %v1383_v0 }
  0xad   : > { %1022 = vmatpush3.bf16.msra.mxu0 %v1166_v45 }
  0xae   : > { %1023 = vmatprep.subr.bf16.mxu0 %v1383_v0 }
  0xb1   : > { %1024 = vmatpush3.bf16.msra.mxu0 %v1167_v46 }
  0xb2   : > { %1025 = vmatprep.subr.bf16.mxu0 %v1383_v0 }
  0xb5   : > { %1026 = vmatpush3.bf16.msra.mxu0 %v1168_v47 }
 0x158   : > { %v616_v48 = vpop.f32.mrf.mxu1  ;;  %v967_v49 = vpop.f32.mrf.mxu0 }
 0x15a   : > { %v1009_v50 = vpop.f32.mrf.mxu1  ;;  %v968_v52 = vpop.f32.mrf.mxu0 }
 0x15b   : > { %v969_v53 = vadd.f32 %v968_v52, %v967_v49 }
 0x15c   : > { %v619_v54 = vpop.f32.mrf.mxu1  ;;  %v970_v55 = vpop.f32.mrf.mxu0 }
 0x15d   : > { %v576_v56 = vadd.f32 %v969_v53, %v894_v51 }
 0x15e   : > { %v1010_v57 = vpop.f32.mrf.mxu1  ;;  %v971_v58 = vpop.f32.mrf.mxu0 }
 0x15f   : > { %v972_v59 = vadd.f32 %v971_v58, %v970_v55  ;;  %v617_v60 = vadd.f32 %v616_v48, %v576_v56 }
 0x161   : > { %v579_v61 = vadd.f32 %v972_v59, %v894_v51  ;;  %v623_v63 = vmax.f32 %v617_v60, 0.0 }
 0x163   : > { %v620_v62 = vadd.f32 %v619_v54, %v579_v61 }
 0x165   : > { %v624_v0 = vmax.f32 %v620_v62, 0.0 }
 0x167   : > { %v625_v1 = vpack.c.bf16 %v624_v0, %v623_v63 }
 0x169   : > { %1028 = vmatmul.mubr.bf16.vlgmr.msra.gmra.mxu0 %v625_v1 }
 0x229   : > { %v731_v3 = vpop.f32.mrf.mxu0 }
 0x22a   : > { %v732_v4 = vadd.f32 %v922_v2, %v731_v3 }
 0x22b   : > { %v1029_v5 = vpop.f32.mrf.mxu0 }
 0x22c   : > { %v738_v6 = vadd.f32 %v732_v4, %v1617_v23 }
 0x22d   : > { %v734_v7 = vpop.f32.mrf.mxu0 }
 0x22e   : > { %740 = vst [vmem:[%s1576_s29] sm:$0xff] %v738_v6  ;;  %v735_v8 = vadd.f32 %v922_v2, %v734_v7 }
 0x22f   : > { %v1030_v9 = vpop.f32.mrf.mxu0 }
 0x230   : > { %v739_v10 = vadd.f32 %v735_v8, %v1620_v24 }
 0x232   : > { %741 = vst [vmem:[%s1576_s29 + $0x8] sm:$0xff] %v739_v10 }
 0x233   : > { %1287 = shalt.err (!%p1284_p10)
}
 0x234   : > { %s1288_s29 = scalar_lea.hbm %s1655_s27, 256  ;;  %s1292_s16 = scalar_lea.hbm %s1719_s5, 2048 }
 0x235   : > { %p1289_p12 = scmp.ne.s32.totalorder %s1655_s27, %s1288_s29  ;;  %p1293_p2 = scmp.lt.s32.totalorder %s1655_s27, %s1719_s5 }
 0x236   : > { %p1294_p13 = scmp.lt.s32.totalorder %s1292_s16, %s1288_s29 }
 0x237   : > { %p1290_p1 = pnand %p1289_p12, %p1470_p3 }
 0x238   : > { %p1295_p4 = por %p1294_p13, %p1293_p2 }
 0x239   : > { %p1291_p11 = pneg %p1290_p1 }
 0x23b   : > { %p1296_p8 = pnand %p1295_p4, %p1291_p11 }
 0x23d   : > { %1299 = shalt.err (!%p1296_p8)
}
 0x23e   : > { %s1386_s24 = smov 128   ;;  %s1387_s28 = smov 8  }
 0x23f   : > { %1043 = dma.vmem_to_hbm [thread:$0]  (%p1470_p3), %s1657_s6, 256, %s1655_s27, %s1663_s14, %s1386_s24, %s1386_s24, %s1387_s28  }
 0x240 PF: > { %p1062_p0 = scmp.ge.s32.totalorder %s1376_s25, 2  ;;  %s773_s13 = sand.u32 1, %s1348_s18  }
 0x241   : > { %p1747_p5 = scmp.ne.s32.totalorder %s1736_s8, 0  ;;  %s774_s17 = scalar_lea.sflag [#allocation7], %s773_s13 }
 0x243   : > { %p1053_p6 = pnand %p1062_p0, %p1747_p5 }
 0x245   : > { %p1054_p7 = pneg %p1053_p6 }
 0x247   : > { %1343 = dma.done.wait (%p1054_p7), %s774_s17, 256  }
 0x248   : > { %1345 = vsyncadd (%p1054_p7), %s774_s17, 4294967040  ;;  %s20_s25 = sadd.s32 1, %s1376_s25   ;;  %s1748_s9 = sld [smem:[#allocation21_spill]] }
 0x249   : > { %p17_p9 = scmp.ge.s32.totalorder %s20_s25, 10   ;;  %s1749_s20 = sld [smem:[#allocation26_spill]] }
 0x24a   : > { %s1750_s21 = sld [smem:[#allocation22_spill]]  ;;  %s1754_s18 = smov %s1352_s19 }
 0x24b   : > { %s1751_s22 = sld [smem:[#allocation23_spill]]  ;;  %19 = sbr.rel (!%p17_p9) target bundleno = 10 (0xa), region = 100 }
 0x24c   : > { %s1752_s23 = sld [smem:[#allocation24_spill]] }
 0x24d   : > { %s1753_s24 = sld [smem:[#allocation25_spill]] }
 0x24e   : > { %s1755_s19 = smov %s1748_s9 }
 0x250   :  { %779 = vsyncpa [#allocation6], 1 }
 0x251   :  { %781 = vsyncpa [#allocation6 + $0x1], 1 }
 0x252   :  { %782 = vsyncpa [#allocation9], 1 }
 0x253   :  { %783 = vsyncpa [#allocation7], 1 }
 0x254   :  { %785 = vsyncpa [#allocation7 + $0x1], 1 }
 0x255   :  { %786 = vsyncmov [#allocation4] }
 0x258   :  { %s787_s7 = vpop.sfrf %786 }
 0x259   :  { %p937_p3 = scmp.ne.s32.totalorder %s787_s7, 0 }
 0x25b   :  { %791 = shalt.err (%p937_p3)  }
 0x25c   :  { %793 = vsyncmov [#allocation4 + $0x1] }
 0x25f   :  { %s794_s8 = vpop.sfrf %793 }
 0x260   :  { %p938_p10 = scmp.ne.s32.totalorder %s794_s8, 0 }
 0x262   :  { %798 = shalt.err (%p938_p10)  }

</bundles_post_ra>
